<compile_context>
chip_gen: v5e
topology: v5e:2x2
jax: 0.10.0
libtpu: 0.0.40
codegen_flags: <defaults>
</compile_context>

<pallas_src>
import functools

import jax
import jax.numpy as jnp
from jax.experimental import pallas as pl
from jax.experimental.pallas import tpu as pltpu


def _round_up(x, m):
    return ((x + m - 1) // m) * m


def _vmem_capacity_bytes():
    """Generation-aware VMEM capacity (v5e/v6e: 128 MiB, v7x: 64 MiB per TC)."""
    try:
        return int(pltpu.get_tpu_info().vmem_capacity_bytes)
    except Exception:
        return 64 * 1024 * 1024          # conservative (v7x-sized) fallback


def _pick_tile(batch_rows, d_in, hid, d_out, in_isz, out_isz, w_isz, vmem_cap):
    """Batch tile: multiple of the sublane packing, sized so the double-buffered
    activation tiles + resident weights fit comfortably in VMEM, and capped at
    ceil(B/2) so a 2-TensorCore chip (v7x) gets at least two grid blocks."""
    sub = 16 if min(in_isz, out_isz) < 4 else 8
    if batch_rows <= sub:
        return batch_rows                                   # single full-dim block
    # Resident weights/biases; charge 2 buffers (worst case if Buffered(1) is unavailable).
    w_bytes = 2 * ((d_in * hid + hid * d_out) * w_isz + (hid + d_out) * 4)
    budget = max(4 * 1024 * 1024, int(vmem_cap * 0.6) - w_bytes)
    # Per-row VMEM: double-buffered input/output tiles + f32 intermediates.
    per_row = 2 * (d_in * in_isz + d_out * out_isz) + (d_in + hid + d_out) * 4
    cap = 2048 if vmem_cap > 96 * 1024 * 1024 else 512      # bigger tiles on 128 MiB parts
    tb = max(sub, min(cap, (budget // per_row) // sub * sub))
    tb = min(tb, max(sub, _round_up(pl.cdiv(batch_rows, 2), sub)))  # >=2 blocks (v7x megacore)
    tb = min(tb, _round_up(batch_rows, sub))
    return tb


def _mlp_kernel(x_ref, w1_ref, b1_ref, w2_ref, b2_ref, o_ref):
    # enc: (TB, D) @ (D, H) on the MXU with f32 accumulation. x is cast to the
    # weight dtype in-kernel so bf16 weights hit the bf16 MXU path without an
    # extra HBM cast pass in the wrapper (no-op when everything is f32).
    x = x_ref[...].astype(w1_ref.dtype)
    h = jnp.dot(x, w1_ref[...], preferred_element_type=jnp.float32)
    h = jnp.maximum(h + b1_ref[...], 0.0)                   # bias + ReLU in f32 on the VPU
    # dec: (TB, H) @ (H, D_out), again with f32 accumulation.
    y = jnp.dot(h.astype(w2_ref.dtype), w2_ref[...],
                preferred_element_type=jnp.float32)
    o_ref[...] = (y + b2_ref[...]).astype(o_ref.dtype)      # store directly in the final dtype


@functools.lru_cache(maxsize=None)
def _build_mlp_call(b_rows, d_in, hid, d_out, x_dtype, w_dtype, out_dtype, tb,
                    vmem_cap, single_buffer_weights):
    grid = (pl.cdiv(b_rows, tb),)

    if single_buffer_weights:
        # Block index never changes -> one VMEM buffer suffices (halves weight footprint).
        def const_spec(shape):
            return pl.BlockSpec(shape, lambda i: (0, 0), pipeline_mode=pl.Buffered(1))
    else:
        def const_spec(shape):
            return pl.BlockSpec(shape, lambda i: (0, 0))

    w_isz = jnp.dtype(w_dtype).itemsize
    flops = 2 * b_rows * hid * (d_in + d_out)
    bytes_accessed = (b_rows * d_in * jnp.dtype(x_dtype).itemsize
                      + b_rows * d_out * jnp.dtype(out_dtype).itemsize
                      + (d_in * hid + hid * d_out) * w_isz
                      + (hid + d_out) * 4)

    call = pl.pallas_call(
        _mlp_kernel,
        out_shape=jax.ShapeDtypeStruct((b_rows, d_out), out_dtype),
        grid_spec=pltpu.PrefetchScalarGridSpec(
            num_scalar_prefetch=0,
            grid=grid,
            in_specs=[
                # Activations: batch-tiled -> pipelined HBM<->VMEM DMA overlapped with MXU.
                pl.BlockSpec((tb, d_in), lambda i: (i, 0)),
                # Weights / biases: full-shape blocks, constant index -> VMEM-resident.
                const_spec((d_in, hid)),
                const_spec((1, hid)),
                const_spec((hid, d_out)),
                const_spec((1, d_out)),
            ],
            out_specs=pl.BlockSpec((tb, d_out), lambda i: (i, 0)),
        ),
        compiler_params=pltpu.CompilerParams(
            dimension_semantics=("parallel",),              # megacore-shard batch on v7x
            vmem_limit_bytes=vmem_cap * 3 // 4,             # 48 MiB (v7x) / 96 MiB (v5e/v6e)
        ),
        cost_estimate=pl.CostEstimate(
            flops=flops, transcendentals=0, bytes_accessed=bytes_accessed),
    )
    return jax.jit(call)


_PIPELINE_STATE = {"single_buffer_weights": True}


def _mlp_pallas(x2d, w1, b1, w2, b2, tb, out_dtype, vmem_cap):
    args = (x2d, w1, b1, w2, b2)
    cfg = (x2d.shape[0], x2d.shape[1], w1.shape[1], w2.shape[1],
           jnp.dtype(x2d.dtype), jnp.dtype(w1.dtype), jnp.dtype(out_dtype),
           int(tb), int(vmem_cap))
    if _PIPELINE_STATE["single_buffer_weights"]:
        try:
            return _build_mlp_call(*cfg, True)(*args)
        except Exception:
            # pipeline_mode=pl.Buffered(1) unsupported here -> default double buffering.
            _PIPELINE_STATE["single_buffer_weights"] = False
    return _build_mlp_call(*cfg, False)(*args)


class NextSyllablePallas:
    """JAX/Pallas port of the PyTorch NextSyllable module."""

    def __init__(self, state_num_layers, state_hidden_size, hidden_size=50,
                 key=None, compute_dtype=jnp.float32):
        if key is None:
            key = jax.random.PRNGKey(0)
        self.d_state = state_num_layers * state_hidden_size
        self.hidden_size = hidden_size
        self.compute_dtype = jnp.dtype(compute_dtype)

        k1, k2, k3, k4 = jax.random.split(key, 4)
        # nn.Linear-style init: U(-1/sqrt(fan_in), 1/sqrt(fan_in)).
        lim_enc = 1.0 / (self.d_state ** 0.5)
        lim_dec = 1.0 / (hidden_size ** 0.5)
        # Unpadded reference parameters (also used by the batch=False matvec path).
        self.w_enc = jax.random.uniform(k1, (self.d_state, hidden_size),
                                        jnp.float32, -lim_enc, lim_enc)
        self.b_enc = jax.random.uniform(k2, (hidden_size,),
                                        jnp.float32, -lim_enc, lim_enc)
        self.w_dec = jax.random.uniform(k3, (hidden_size, self.d_state),
                                        jnp.float32, -lim_dec, lim_dec)
        self.b_dec = jax.random.uniform(k4, (self.d_state,),
                                        jnp.float32, -lim_dec, lim_dec)

        # Kernel-side parameters:
        #  - encoder K stays UNPADDED (matches the unpadded activation blocks),
        #  - hidden dim padded to a lane multiple (intermediate stays lane-dense),
        #  - decoder output padded to a lane multiple only when d_state is not
        #    already one (keeps unmasked lane-dense stores; sliced once afterwards).
        self.h_pad = _round_up(hidden_size, 128)
        self.d_out_k = self.d_state if self.d_state % 128 == 0 else _round_up(self.d_state, 128)
        self.needs_out_slice = self.d_out_k != self.d_state

        w_enc_p = jnp.zeros((self.d_state, self.h_pad), jnp.float32)
        w_enc_p = w_enc_p.at[:, :hidden_size].set(self.w_enc)
        b_enc_p = jnp.zeros((1, self.h_pad), jnp.float32)
        b_enc_p = b_enc_p.at[0, :hidden_size].set(self.b_enc)
        w_dec_p = jnp.zeros((self.h_pad, self.d_out_k), jnp.float32)
        w_dec_p = w_dec_p.at[:hidden_size, :self.d_state].set(self.w_dec)
        b_dec_p = jnp.zeros((1, self.d_out_k), jnp.float32)
        b_dec_p = b_dec_p.at[0, :self.d_state].set(self.b_dec)

        # Matmul operands optionally bf16 (MXU fast path, halves weight HBM/VMEM);
        # biases stay f32 (bias add / ReLU run in f32 on the VPU).
        self.w_enc_p = w_enc_p.astype(self.compute_dtype)
        self.w_dec_p = w_dec_p.astype(self.compute_dtype)
        self.b_enc_p = b_enc_p
        self.b_dec_p = b_dec_p

    def __call__(self, inputs, batch=False):
        shapes = inputs.shape
        out_dtype = inputs.dtype

        if not batch:
            # Single state vector: pallas_call launch overhead dwarfs the matvec.
            x = inputs.reshape(-1).astype(jnp.float32)
            h = jnp.maximum(x @ self.w_enc + self.b_enc, 0.0)
            y = h @ self.w_dec + self.b_dec
            return y.reshape(shapes).astype(out_dtype)

        batch_rows = shapes[1]
        x2d = inputs.reshape(batch_rows, -1)        # == torch .view(shapes[1], -1)

        # Kernel stores directly in the final dtype when it is TPU-friendly.
        k_out = jnp.dtype(out_dtype)
        if k_out not in (jnp.dtype(jnp.float32), jnp.dtype(jnp.bfloat16)):
            k_out = jnp.dtype(jnp.float32)

        vmem_cap = _vmem_capacity_bytes()
        tb = _pick_tile(batch_rows, self.d_state, self.h_pad, self.d_out_k,
                        x2d.dtype.itemsize, k_out.itemsize,
                        self.compute_dtype.itemsize, vmem_cap)

        out = _mlp_pallas(x2d, self.w_enc_p, self.b_enc_p,
                          self.w_dec_p, self.b_dec_p, tb, k_out, vmem_cap)
        if self.needs_out_slice:
            out = out[:, :self.d_state]             # drop lane padding (only when needed)
        if out.dtype != out_dtype:
            out = out.astype(out_dtype)             # no-op for f32/bf16 inputs
        return out.reshape(shapes)                  # free bitcast reshape back to state shape


if __name__ == "__main__":
    key = jax.random.PRNGKey(0)
    k_in, k_par, k_in2 = jax.random.split(key, 3)

    def ref(m, inp, is_batch):
        s = inp.shape
        x2 = inp.reshape(s[1], -1) if is_batch else inp.reshape(1, -1)
        h = jnp.maximum(x2 @ m.w_enc + m.b_enc, 0.0)
        return (h @ m.w_dec + m.b_dec).reshape(s)

    # Case 1: d_state = 32 (NOT lane-aligned) -> padded lane-dense output + one slice.
    state_num_layers, state_hidden_size, hidden_size, batch = 2, 16, 32, 4
    model = NextSyllablePallas(state_num_layers, state_hidden_size,
                               hidden_size=hidden_size, key=k_par)
    x = jax.random.normal(k_in, (state_num_layers, batch, state_hidden_size),
                          dtype=jnp.float32)
    y = model(x, batch=True)
    jax.block_until_ready(y)
    assert y.shape == x.shape
    assert jnp.allclose(y, ref(model, x, True), atol=1e-5, rtol=1e-5)

    # batch=False path (single state (NL, HS)): plain matvec.
    x_single = jax.random.normal(jax.random.PRNGKey(1),
                                 (state_num_layers, state_hidden_size),
                                 dtype=jnp.float32)
    y_single = model(x_single, batch=False)
    jax.block_until_ready(y_single)
    assert y_single.shape == x_single.shape
    assert jnp.allclose(y_single, ref(model, x_single, False), atol=1e-5, rtol=1e-5)

    # Case 2: d_state = 128 (lane-aligned, no padding anywhere) and batch=20,
    # which is not a tile multiple -> exercises the partial final grid block.
    model2 = NextSyllablePallas(2, 64, hidden_size=50, key=k_par)
    x2 = jax.random.normal(k_in2, (2, 20, 64), dtype=jnp.float32)
    y2 = model2(x2, batch=True)
    jax.block_until_ready(y2)
    assert y2.shape == x2.shape
    assert jnp.allclose(y2, ref(model2, x2, True), atol=1e-5, rtol=1e-5)

    # Case 3: bf16 weights + bf16 I/O (MXU fast path, f32 accumulation), relaxed tol.
    model_bf16 = NextSyllablePallas(state_num_layers, state_hidden_size,
                                    hidden_size=hidden_size, key=k_par,
                                    compute_dtype=jnp.bfloat16)
    y_bf16 = model_bf16(x.astype(jnp.bfloat16), batch=True)
    jax.block_until_ready(y_bf16)
    assert y_bf16.shape == x.shape
    assert y_bf16.dtype == jnp.bfloat16
    assert jnp.allclose(y_bf16.astype(jnp.float32), ref(model, x, True),
                        atol=5e-2, rtol=5e-2)

    print("KERNEL_OK")
</pallas_src>

<mosaic_0001>
module attributes {stable_mosaic.version = 11 : i64} {
  func.func @_mlp_kernel(%arg0: i32, %arg1: memref<4x32xf32, #tpu.memory_space<vmem>>, %arg2: memref<32x128xf32, #tpu.memory_space<vmem>>, %arg3: memref<1x128xf32, #tpu.memory_space<vmem>>, %arg4: memref<128x128xf32, #tpu.memory_space<vmem>>, %arg5: memref<1x128xf32, #tpu.memory_space<vmem>>, %arg6: memref<4x128xf32, #tpu.memory_space<vmem>>) attributes {dimension_semantics = [#tpu.dimension_semantics<parallel>], iteration_bounds = array<i64: 1>, scalar_prefetch = 0 : i64, scratch_operands = 0 : i64, tpu.core_type = #tpu.core_type<tc>, window_params = [{transform_indices = @transform_0, window_bounds = array<i64: 4, 32>}, {pipeline_mode = #tpu.pipeline_mode<synchronous>, transform_indices = @transform_1, window_bounds = array<i64: 32, 128>}, {pipeline_mode = #tpu.pipeline_mode<synchronous>, transform_indices = @transform_2, window_bounds = array<i64: 1, 128>}, {pipeline_mode = #tpu.pipeline_mode<synchronous>, transform_indices = @transform_3, window_bounds = array<i64: 128, 128>}, {pipeline_mode = #tpu.pipeline_mode<synchronous>, transform_indices = @transform_4, window_bounds = array<i64: 1, 128>}, {transform_indices = @transform_5, window_bounds = array<i64: 4, 128>}]} {
    %c0 = arith.constant 0 : index
    %c0_0 = arith.constant 0 : index
    %0 = vector.load %arg1[%c0, %c0_0] : memref<4x32xf32, #tpu.memory_space<vmem>>, vector<4x32xf32>
    %c0_1 = arith.constant 0 : index
    %c0_2 = arith.constant 0 : index
    %1 = vector.load %arg2[%c0_1, %c0_2] : memref<32x128xf32, #tpu.memory_space<vmem>>, vector<32x128xf32>
    %cst = arith.constant dense<0.000000e+00> : vector<4x128xf32>
    %2 = tpu.matmul %0, %1, %cst {dimension_numbers = #tpu.dot_dimension_numbers<[1], [0], [0], [1], [0, 0, 1, 1], [], []>} : vector<4x32xf32>, vector<32x128xf32>, vector<4x128xf32> -> vector<4x128xf32>
    %c0_3 = arith.constant 0 : index
    %c0_4 = arith.constant 0 : index
    %3 = vector.load %arg3[%c0_3, %c0_4] : memref<1x128xf32, #tpu.memory_space<vmem>>, vector<1x128xf32>
    %4 = vector.broadcast %3 : vector<1x128xf32> to vector<4x128xf32>
    %5 = arith.addf %2, %4 : vector<4x128xf32>
    %cst_5 = arith.constant 0.000000e+00 : f32
    %6 = vector.broadcast %cst_5 : f32 to vector<4x128xf32>
    %7 = arith.maximumf %5, %6 : vector<4x128xf32>
    %c0_6 = arith.constant 0 : index
    %c0_7 = arith.constant 0 : index
    %8 = vector.load %arg4[%c0_6, %c0_7] : memref<128x128xf32, #tpu.memory_space<vmem>>, vector<128x128xf32>
    %cst_8 = arith.constant dense<0.000000e+00> : vector<4x128xf32>
    %9 = tpu.matmul %7, %8, %cst_8 {dimension_numbers = #tpu.dot_dimension_numbers<[1], [0], [0], [1], [0, 0, 1, 1], [], []>} : vector<4x128xf32>, vector<128x128xf32>, vector<4x128xf32> -> vector<4x128xf32>
    %c0_9 = arith.constant 0 : index
    %c0_10 = arith.constant 0 : index
    %10 = vector.load %arg5[%c0_9, %c0_10] : memref<1x128xf32, #tpu.memory_space<vmem>>, vector<1x128xf32>
    %11 = vector.broadcast %10 : vector<1x128xf32> to vector<4x128xf32>
    %12 = arith.addf %9, %11 : vector<4x128xf32>
    %c0_11 = arith.constant 0 : index
    %c0_12 = arith.constant 0 : index
    %13 = vector.load %arg6[%c0_11, %c0_12] : memref<4x128xf32, #tpu.memory_space<vmem>>, vector<4x128xf32>
    tpu.vector_store %arg6[%c0_11, %c0_12], %12 {strides = array<i32>} : memref<4x128xf32, #tpu.memory_space<vmem>>, vector<4x128xf32>,
    return
  }
  func.func @transform_0(%arg0: i32) -> (i32, i32) {
    %c0_i32 = arith.constant 0 : i32
    %c0_i32_0 = arith.constant 0 : i32
    return %arg0, %c0_i32 : i32, i32
  }
  func.func @transform_1(%arg0: i32) -> (i32, i32) {
    %c0_i32 = arith.constant 0 : i32
    %c0_i32_0 = arith.constant 0 : i32
    %c0_i32_1 = arith.constant 0 : i32
    return %c0_i32, %c0_i32_0 : i32, i32
  }
  func.func @transform_2(%arg0: i32) -> (i32, i32) {
    %c0_i32 = arith.constant 0 : i32
    %c0_i32_0 = arith.constant 0 : i32
    %c0_i32_1 = arith.constant 0 : i32
    return %c0_i32, %c0_i32_0 : i32, i32
  }
  func.func @transform_3(%arg0: i32) -> (i32, i32) {
    %c0_i32 = arith.constant 0 : i32
    %c0_i32_0 = arith.constant 0 : i32
    %c0_i32_1 = arith.constant 0 : i32
    return %c0_i32, %c0_i32_0 : i32, i32
  }
  func.func @transform_4(%arg0: i32) -> (i32, i32) {
    %c0_i32 = arith.constant 0 : i32
    %c0_i32_0 = arith.constant 0 : i32
    %c0_i32_1 = arith.constant 0 : i32
    return %c0_i32, %c0_i32_0 : i32, i32
  }
  func.func @transform_5(%arg0: i32) -> (i32, i32) {
    %c0_i32 = arith.constant 0 : i32
    %c0_i32_0 = arith.constant 0 : i32
    return %arg0, %c0_i32 : i32, i32
  }
}

module attributes {stable_mosaic.version = 11 : i64} {
  func.func @_mlp_kernel(%arg0: i32, %arg1: memref<4x32xf32, #tpu.memory_space<vmem>>, %arg2: memref<32x128xf32, #tpu.memory_space<vmem>>, %arg3: memref<1x128xf32, #tpu.memory_space<vmem>>, %arg4: memref<128x128xf32, #tpu.memory_space<vmem>>, %arg5: memref<1x128xf32, #tpu.memory_space<vmem>>, %arg6: memref<4x128xf32, #tpu.memory_space<vmem>>) attributes {dimension_semantics = [#tpu.dimension_semantics<parallel>], iteration_bounds = array<i64: 1>, scalar_prefetch = 0 : i64, scratch_operands = 0 : i64, tpu.core_type = #tpu.core_type<tc>, window_params = [{transform_indices = @transform_0, window_bounds = array<i64: 4, 32>}, {pipeline_mode = #tpu.pipeline_mode<synchronous>, transform_indices = @transform_1, window_bounds = array<i64: 32, 128>}, {pipeline_mode = #tpu.pipeline_mode<synchronous>, transform_indices = @transform_2, window_bounds = array<i64: 1, 128>}, {pipeline_mode = #tpu.pipeline_mode<synchronous>, transform_indices = @transform_3, window_bounds = array<i64: 128, 128>}, {pipeline_mode = #tpu.pipeline_mode<synchronous>, transform_indices = @transform_4, window_bounds = array<i64: 1, 128>}, {transform_indices = @transform_5, window_bounds = array<i64: 4, 128>}]} {
    %c0 = arith.constant 0 : index
    %c0_0 = arith.constant 0 : index
    %0 = vector.load %arg1[%c0, %c0_0] : memref<4x32xf32, #tpu.memory_space<vmem>>, vector<4x32xf32>
    %c0_1 = arith.constant 0 : index
    %c0_2 = arith.constant 0 : index
    %1 = vector.load %arg2[%c0_1, %c0_2] : memref<32x128xf32, #tpu.memory_space<vmem>>, vector<32x128xf32>
    %cst = arith.constant dense<0.000000e+00> : vector<4x128xf32>
    %2 = tpu.matmul %0, %1, %cst {dimension_numbers = #tpu.dot_dimension_numbers<[1], [0], [0], [1], [0, 0, 1, 1], [], []>} : vector<4x32xf32>, vector<32x128xf32>, vector<4x128xf32> -> vector<4x128xf32>
    %c0_3 = arith.constant 0 : index
    %c0_4 = arith.constant 0 : index
    %3 = vector.load %arg3[%c0_3, %c0_4] : memref<1x128xf32, #tpu.memory_space<vmem>>, vector<1x128xf32>
    %4 = vector.broadcast %3 : vector<1x128xf32> to vector<4x128xf32>
    %5 = arith.addf %2, %4 : vector<4x128xf32>
    %cst_5 = arith.constant 0.000000e+00 : f32
    %6 = vector.broadcast %cst_5 : f32 to vector<4x128xf32>
    %7 = arith.maximumf %5, %6 : vector<4x128xf32>
    %c0_6 = arith.constant 0 : index
    %c0_7 = arith.constant 0 : index
    %8 = vector.load %arg4[%c0_6, %c0_7] : memref<128x128xf32, #tpu.memory_space<vmem>>, vector<128x128xf32>
    %cst_8 = arith.constant dense<0.000000e+00> : vector<4x128xf32>
    %9 = tpu.matmul %7, %8, %cst_8 {dimension_numbers = #tpu.dot_dimension_numbers<[1], [0], [0], [1], [0, 0, 1, 1], [], []>} : vector<4x128xf32>, vector<128x128xf32>, vector<4x128xf32> -> vector<4x128xf32>
    %c0_9 = arith.constant 0 : index
    %c0_10 = arith.constant 0 : index
    %10 = vector.load %arg5[%c0_9, %c0_10] : memref<1x128xf32, #tpu.memory_space<vmem>>, vector<1x128xf32>
    %11 = vector.broadcast %10 : vector<1x128xf32> to vector<4x128xf32>
    %12 = arith.addf %9, %11 : vector<4x128xf32>
    %c0_11 = arith.constant 0 : index
    %c0_12 = arith.constant 0 : index
    %13 = vector.load %arg6[%c0_11, %c0_12] : memref<4x128xf32, #tpu.memory_space<vmem>>, vector<4x128xf32>
    tpu.vector_store %arg6[%c0_11, %c0_12], %12 {strides = array<i32>} : memref<4x128xf32, #tpu.memory_space<vmem>>, vector<4x128xf32>,
    return
  }
  func.func @transform_0(%arg0: i32) -> (i32, i32) {
    %c0_i32 = arith.constant 0 : i32
    %c0_i32_0 = arith.constant 0 : i32
    return %arg0, %c0_i32 : i32, i32
  }
  func.func @transform_1(%arg0: i32) -> (i32, i32) {
    %c0_i32 = arith.constant 0 : i32
    %c0_i32_0 = arith.constant 0 : i32
    %c0_i32_1 = arith.constant 0 : i32
    return %c0_i32, %c0_i32_0 : i32, i32
  }
  func.func @transform_2(%arg0: i32) -> (i32, i32) {
    %c0_i32 = arith.constant 0 : i32
    %c0_i32_0 = arith.constant 0 : i32
    %c0_i32_1 = arith.constant 0 : i32
    return %c0_i32, %c0_i32_0 : i32, i32
  }
  func.func @transform_3(%arg0: i32) -> (i32, i32) {
    %c0_i32 = arith.constant 0 : i32
    %c0_i32_0 = arith.constant 0 : i32
    %c0_i32_1 = arith.constant 0 : i32
    return %c0_i32, %c0_i32_0 : i32, i32
  }
  func.func @transform_4(%arg0: i32) -> (i32, i32) {
    %c0_i32 = arith.constant 0 : i32
    %c0_i32_0 = arith.constant 0 : i32
    %c0_i32_1 = arith.constant 0 : i32
    return %c0_i32, %c0_i32_0 : i32, i32
  }
  func.func @transform_5(%arg0: i32) -> (i32, i32) {
    %c0_i32 = arith.constant 0 : i32
    %c0_i32_0 = arith.constant 0 : i32
    return %arg0, %c0_i32 : i32, i32
  }
}

</mosaic_0001>

<bundles_post_ra>
// kernel: tpu_custom_call.1
= control target key start
LH: loop header
LB: loop body
LE: loop exit
PB: predicated region body
PF: predicated region fallthrough
CT: control target
= control target key end

     0   :  { %10 = vsyncpa [#allocation3], 0  ;;  %s324_s0 = inlined_call_operand.hbm [shape: f32[4,32], index: 0, kind: input, shape index: {}]   ;;  %s325_s1 = inlined_call_operand.hbm [shape: f32[32,128], index: 1, kind: input, shape index: {}]   ;;  %s326_s2 = inlined_call_operand.vmem [shape: f32[1,128], index: 2, kind: input, shape index: {}]   ;;  %s327_s3 = inlined_call_operand.hbm [shape: f32[128,128], index: 3, kind: input, shape index: {}]   ;;  %s328_s4 = inlined_call_operand.vmem [shape: f32[1,128], index: 4, kind: input, shape index: {}]   ;;  %s329_s5 = inlined_call_operand.hbm [shape: f32[4,128], index: 5, kind: output, shape index: {}]  }
   0x1   :  { %11 = vsyncpa [#allocation6], 0  ;;  %s28_s20 = sshll.u32 %s325_s1, 4  ;;  %s29_s20 = int_to_ptr.hbm [resolvable:$true] %s28_s20 }
   0x2   :  { %12 = vsyncpa [#allocation4], 0  ;;  %s270_s21 = smov [#allocation5]   ;;  %s18_s25 = sshll.u32 %s324_s0, 4  ;;  %s19_s25 = int_to_ptr.hbm [resolvable:$true] %s18_s25 }
   0x3   :  { %s30_s22 = sshll.u32 %s270_s21, 4  ;;  %s271_s26 = smov 128   ;;  %s31_s22 = int_to_ptr.vmem [resolvable:$true] %s30_s22 }
   0x4   :  { %s272_s27 = smov 8   ;;  %s273_s28 = smov [#allocation2]  }
   0x5   :  { %36 = dma.hbm_to_vmem [thread:$0]  %s29_s20, 512, %s31_s22, [#allocation6], %s271_s26, %s271_s26, %s272_s27  }
   0x6   :  { %s20_s29 = sshll.u32 %s273_s28, 4  ;;  %s43_s7 = sshll.u32 %s327_s3, 4  ;;  %s21_s29 = int_to_ptr.vmem [resolvable:$true] %s20_s29  ;;  %s44_s7 = int_to_ptr.hbm [resolvable:$true] %s43_s7 }
   0x7   :  { %23 = dma.hbm_to_vmem [thread:$0]  %s19_s25, 64, %s21_s29, [#allocation3]  }
   0x8   :  { %s274_s1 = smov [#allocation7]  }
   0x9   :  { %s45_s8 = sshll.u32 %s274_s1, 4  ;;  %s46_s8 = int_to_ptr.vmem [resolvable:$true] %s45_s8 }
   0xa   :  { %51 = dma.hbm_to_vmem [thread:$0]  %s44_s7, 2048, %s46_s8, [#allocation6], %s271_s26, %s271_s26, %s272_s27  }
   0xb   :  { %264 = dma.done.wait [#allocation3], 64  }
   0xc   :  { %265 = vsyncadd [#allocation3], 4294967232 }
   0xd   :  { %266 = dma.done.wait [#allocation6], 2560  }
   0xe   :  { %267 = vsyncadd [#allocation6], 4294964736  ;;  %v70_v0 = vld [vmem:[#allocation5 + $0x18] sm:$0xff]  ;;  %v69_v1 = vld [vmem:[#allocation5 + $0x10] sm:$0xff]  ;;  %vm75_vm0 = vcmask 261120   ;;  %s275_s11 = smov [#allocation8]  }
   0xf   :  { %91 = vmatpush.msra.mxu0 %v70_v0  ;;  %v115_v2 = vld [vmem:[#allocation7 + $0x78] sm:$0xff]  ;;  %v68_v3 = vld [vmem:[#allocation5 + $0x8] sm:$0xff]  ;;  %v114_v4 = vld [vmem:[#allocation7 + $0x70] sm:$0xff]  ;;  %s146_s12 = sshll.u32 %s275_s11, 4  ;;  %s148_s15 = sshll.u32 %s329_s5, 4  ;;  %s147_s12 = int_to_ptr.vmem [resolvable:$true] %s146_s12  ;;  %s149_s15 = int_to_ptr.hbm [resolvable:$true] %s148_s15 }
  0x10   :  { %120 = vmatpush.msra.mxu1 %v115_v2  ;;  %v113_v5 = vld [vmem:[#allocation7 + $0x68] sm:$0xff]  ;;  %v67_v6 = vld [vmem:[#allocation5] sm:$0xff]  ;;  %v66_v7 = vld [vmem:[#allocation2] sm:$0xf] }
  0x11   :  { %92 = vmatpush.msra.mxu0 %v69_v1  ;;  %v112_v8 = vld [vmem:[#allocation7 + $0x60] sm:$0xff]  ;;  %v111_v9 = vld [vmem:[#allocation7 + $0x58] sm:$0xff]  ;;  %v110_v10 = vld [vmem:[#allocation7 + $0x50] sm:$0xff] }
  0x12   :  { %121 = vmatpush.msra.mxu1 %v114_v4  ;;  %v109_v11 = vld [vmem:[#allocation7 + $0x48] sm:$0xff]  ;;  %v108_v12 = vld [vmem:[#allocation7 + $0x40] sm:$0xff]  ;;  %v107_v13 = vld [vmem:[#allocation7 + $0x38] sm:$0xff] }
  0x13   :  { %93 = vmatpush.msra.mxu0 %v68_v3  ;;  %v106_v14 = vld [vmem:[#allocation7 + $0x30] sm:$0xff]  ;;  %v105_v15 = vld [vmem:[#allocation7 + $0x28] sm:$0xff]  ;;  %v104_v16 = vld [vmem:[#allocation7 + $0x20] sm:$0xff] }
  0x14   :  { %122 = vmatpush.msra.mxu1 %v113_v5  ;;  %v103_v17 = vld [vmem:[#allocation7 + $0x18] sm:$0xff]  ;;  %v102_v18 = vld [vmem:[#allocation7 + $0x10] sm:$0xff]  ;;  %v101_v19 = vld [vmem:[#allocation7 + $0x8] sm:$0xff] }
  0x15   :  { %94 = vmatpush.msra.mxu0 %v67_v6  ;;  %v100_v20 = vld [vmem:[#allocation7] sm:$0xff]  ;;  %v166_v21 = vld [vmem:[%s326_s2] ss:$0 sm:$0xff] }
  0x16   :  { %159 = vmatmul.msk.f32.vlgmr.msra.gmra.mxu0 %vm75_vm0, %v66_v7  ;;  %123 = vmatpush.msra.mxu1 %v112_v8  ;;  %v167_v25 = vld [vmem:[%s328_s4] ss:$0 sm:$0xff] }
  0x18   :  { %124 = vmatpush.msra.mxu1 %v111_v9 }
  0x1a   :  { %125 = vmatpush.msra.mxu1 %v110_v10 }
  0x1c   :  { %126 = vmatpush.msra.mxu1 %v109_v11 }
  0x1e   :  { %127 = vmatpush.msra.mxu1 %v108_v12 }
  0x20   :  { %128 = vmatpush.msra.mxu1 %v107_v13 }
  0x22   :  { %129 = vmatpush.msra.mxu1 %v106_v14 }
  0x24   :  { %130 = vmatpush.msra.mxu1 %v105_v15 }
  0x26   :  { %131 = vmatpush.msra.mxu1 %v104_v16 }
  0x28   :  { %132 = vmatpush.msra.mxu1 %v103_v17 }
  0x2a   :  { %133 = vmatpush.msra.mxu1 %v102_v18 }
  0x2c   :  { %134 = vmatpush.msra.mxu1 %v101_v19 }
  0x2e   :  { %135 = vmatpush.msra.mxu1 %v100_v20 }
  0x93   :  { %v96_v22 = vpop.f32.mrf.mxu0 }
  0x94   :  { %v97_v23 = vadd.f32 %v166_v21, %v96_v22 }
  0x96   :  { %v99_v24 = vmax.f32 %v97_v23, 0.0 }
  0x98   :  { %136 = vmatmul.f32.vlgmr.msra.gmra.mxu1 %v99_v24 }
 0x115   :  { %v137_v26 = vpop.f32.mrf.mxu1 }
 0x116   :  { %v138_v27 = vadd.f32 %v167_v25, %v137_v26 }
 0x118   :  { %140 = vst [vmem:[#allocation8] sm:$0xf] %v138_v27 }
 0x119   :  { %151 = dma.vmem_to_hbm [thread:$0]  %s147_s12, 64, %s149_s15, [#allocation4]  }
 0x11a   :  { %268 = dma.done.wait [#allocation4], 64  }
 0x11b   :  { %269 = vsyncadd [#allocation4], 4294967232 }
 0x11c   :  { %156 = vsyncpa [#allocation3], 1 }
 0x11d   :  { %157 = vsyncpa [#allocation6], 1 }
 0x11e   :  { %158 = vsyncpa [#allocation4], 1 }

// kernel: tpu_custom_call.1
= control target key start
LH: loop header
LB: loop body
LE: loop exit
PB: predicated region body
PF: predicated region fallthrough
CT: control target
= control target key end

     0   :  { %10 = vsyncpa [#allocation3], 0  ;;  %s324_s0 = inlined_call_operand.hbm [shape: f32[4,32], index: 0, kind: input, shape index: {}]   ;;  %s325_s1 = inlined_call_operand.hbm [shape: f32[32,128], index: 1, kind: input, shape index: {}]   ;;  %s326_s2 = inlined_call_operand.vmem [shape: f32[1,128], index: 2, kind: input, shape index: {}]   ;;  %s327_s3 = inlined_call_operand.hbm [shape: f32[128,128], index: 3, kind: input, shape index: {}]   ;;  %s328_s4 = inlined_call_operand.vmem [shape: f32[1,128], index: 4, kind: input, shape index: {}]   ;;  %s329_s5 = inlined_call_operand.hbm [shape: f32[4,128], index: 5, kind: output, shape index: {}]  }
   0x1   :  { %11 = vsyncpa [#allocation6], 0  ;;  %s28_s20 = sshll.u32 %s325_s1, 4  ;;  %s29_s20 = int_to_ptr.hbm [resolvable:$true] %s28_s20 }
   0x2   :  { %12 = vsyncpa [#allocation4], 0  ;;  %s270_s21 = smov [#allocation5]   ;;  %s18_s25 = sshll.u32 %s324_s0, 4  ;;  %s19_s25 = int_to_ptr.hbm [resolvable:$true] %s18_s25 }
   0x3   :  { %s30_s22 = sshll.u32 %s270_s21, 4  ;;  %s271_s26 = smov 128   ;;  %s31_s22 = int_to_ptr.vmem [resolvable:$true] %s30_s22 }
   0x4   :  { %s272_s27 = smov 8   ;;  %s273_s28 = smov [#allocation2]  }
   0x5   :  { %36 = dma.hbm_to_vmem [thread:$0]  %s29_s20, 512, %s31_s22, [#allocation6], %s271_s26, %s271_s26, %s272_s27  }
   0x6   :  { %s20_s29 = sshll.u32 %s273_s28, 4  ;;  %s43_s7 = sshll.u32 %s327_s3, 4  ;;  %s21_s29 = int_to_ptr.vmem [resolvable:$true] %s20_s29  ;;  %s44_s7 = int_to_ptr.hbm [resolvable:$true] %s43_s7 }
   0x7   :  { %23 = dma.hbm_to_vmem [thread:$0]  %s19_s25, 64, %s21_s29, [#allocation3]  }
   0x8   :  { %s274_s1 = smov [#allocation7]  }
   0x9   :  { %s45_s8 = sshll.u32 %s274_s1, 4  ;;  %s46_s8 = int_to_ptr.vmem [resolvable:$true] %s45_s8 }
   0xa   :  { %51 = dma.hbm_to_vmem [thread:$0]  %s44_s7, 2048, %s46_s8, [#allocation6], %s271_s26, %s271_s26, %s272_s27  }
   0xb   :  { %264 = dma.done.wait [#allocation3], 64  }
   0xc   :  { %265 = vsyncadd [#allocation3], 4294967232 }
   0xd   :  { %266 = dma.done.wait [#allocation6], 2560  }
   0xe   :  { %267 = vsyncadd [#allocation6], 4294964736  ;;  %v70_v0 = vld [vmem:[#allocation5 + $0x18] sm:$0xff]  ;;  %v69_v1 = vld [vmem:[#allocation5 + $0x10] sm:$0xff]  ;;  %vm75_vm0 = vcmask 261120   ;;  %s275_s11 = smov [#allocation8]  }
   0xf   :  { %91 = vmatpush.msra.mxu0 %v70_v0  ;;  %v115_v2 = vld [vmem:[#allocation7 + $0x78] sm:$0xff]  ;;  %v68_v3 = vld [vmem:[#allocation5 + $0x8] sm:$0xff]  ;;  %v114_v4 = vld [vmem:[#allocation7 + $0x70] sm:$0xff]  ;;  %s146_s12 = sshll.u32 %s275_s11, 4  ;;  %s148_s15 = sshll.u32 %s329_s5, 4  ;;  %s147_s12 = int_to_ptr.vmem [resolvable:$true] %s146_s12  ;;  %s149_s15 = int_to_ptr.hbm [resolvable:$true] %s148_s15 }
  0x10   :  { %120 = vmatpush.msra.mxu1 %v115_v2  ;;  %v113_v5 = vld [vmem:[#allocation7 + $0x68] sm:$0xff]  ;;  %v67_v6 = vld [vmem:[#allocation5] sm:$0xff]  ;;  %v66_v7 = vld [vmem:[#allocation2] sm:$0xf] }
  0x11   :  { %92 = vmatpush.msra.mxu0 %v69_v1  ;;  %v112_v8 = vld [vmem:[#allocation7 + $0x60] sm:$0xff]  ;;  %v111_v9 = vld [vmem:[#allocation7 + $0x58] sm:$0xff]  ;;  %v110_v10 = vld [vmem:[#allocation7 + $0x50] sm:$0xff] }
  0x12   :  { %121 = vmatpush.msra.mxu1 %v114_v4  ;;  %v109_v11 = vld [vmem:[#allocation7 + $0x48] sm:$0xff]  ;;  %v108_v12 = vld [vmem:[#allocation7 + $0x40] sm:$0xff]  ;;  %v107_v13 = vld [vmem:[#allocation7 + $0x38] sm:$0xff] }
  0x13   :  { %93 = vmatpush.msra.mxu0 %v68_v3  ;;  %v106_v14 = vld [vmem:[#allocation7 + $0x30] sm:$0xff]  ;;  %v105_v15 = vld [vmem:[#allocation7 + $0x28] sm:$0xff]  ;;  %v104_v16 = vld [vmem:[#allocation7 + $0x20] sm:$0xff] }
  0x14   :  { %122 = vmatpush.msra.mxu1 %v113_v5  ;;  %v103_v17 = vld [vmem:[#allocation7 + $0x18] sm:$0xff]  ;;  %v102_v18 = vld [vmem:[#allocation7 + $0x10] sm:$0xff]  ;;  %v101_v19 = vld [vmem:[#allocation7 + $0x8] sm:$0xff] }
  0x15   :  { %94 = vmatpush.msra.mxu0 %v67_v6  ;;  %v100_v20 = vld [vmem:[#allocation7] sm:$0xff]  ;;  %v166_v21 = vld [vmem:[%s326_s2] ss:$0 sm:$0xff] }
  0x16   :  { %159 = vmatmul.msk.f32.vlgmr.msra.gmra.mxu0 %vm75_vm0, %v66_v7  ;;  %123 = vmatpush.msra.mxu1 %v112_v8  ;;  %v167_v25 = vld [vmem:[%s328_s4] ss:$0 sm:$0xff] }
  0x18   :  { %124 = vmatpush.msra.mxu1 %v111_v9 }
  0x1a   :  { %125 = vmatpush.msra.mxu1 %v110_v10 }
  0x1c   :  { %126 = vmatpush.msra.mxu1 %v109_v11 }
  0x1e   :  { %127 = vmatpush.msra.mxu1 %v108_v12 }
  0x20   :  { %128 = vmatpush.msra.mxu1 %v107_v13 }
  0x22   :  { %129 = vmatpush.msra.mxu1 %v106_v14 }
  0x24   :  { %130 = vmatpush.msra.mxu1 %v105_v15 }
  0x26   :  { %131 = vmatpush.msra.mxu1 %v104_v16 }
  0x28   :  { %132 = vmatpush.msra.mxu1 %v103_v17 }
  0x2a   :  { %133 = vmatpush.msra.mxu1 %v102_v18 }
  0x2c   :  { %134 = vmatpush.msra.mxu1 %v101_v19 }
  0x2e   :  { %135 = vmatpush.msra.mxu1 %v100_v20 }
  0x93   :  { %v96_v22 = vpop.f32.mrf.mxu0 }
  0x94   :  { %v97_v23 = vadd.f32 %v166_v21, %v96_v22 }
  0x96   :  { %v99_v24 = vmax.f32 %v97_v23, 0.0 }
  0x98   :  { %136 = vmatmul.f32.vlgmr.msra.gmra.mxu1 %v99_v24 }
 0x115   :  { %v137_v26 = vpop.f32.mrf.mxu1 }
 0x116   :  { %v138_v27 = vadd.f32 %v167_v25, %v137_v26 }
 0x118   :  { %140 = vst [vmem:[#allocation8] sm:$0xf] %v138_v27 }
 0x119   :  { %151 = dma.vmem_to_hbm [thread:$0]  %s147_s12, 64, %s149_s15, [#allocation4]  }
 0x11a   :  { %268 = dma.done.wait [#allocation4], 64  }
 0x11b   :  { %269 = vsyncadd [#allocation4], 4294967232 }
 0x11c   :  { %156 = vsyncpa [#allocation3], 1 }
 0x11d   :  { %157 = vsyncpa [#allocation6], 1 }
 0x11e   :  { %158 = vsyncpa [#allocation4], 1 }

</bundles_post_ra>
